<compile_context>
chip_gen: v7x
topology: tpu7x:2x2x1
jax: 0.10.0
libtpu: 0.0.40
codegen_flags: <defaults>
</compile_context>

<pallas_src>
import functools

import jax
import jax.numpy as jnp
from jax.experimental import pallas as pl
from jax.experimental.pallas import tpu as pltpu

_LANE = 128  # native lane width; narrow layer widths are zero-padded to this


# ----------------------------------------------------------------------------
# Kernel: whole forward pass fused. 5 MXU matmuls (bf16 in, f32 acc) + 4 tanh.
# ----------------------------------------------------------------------------
def simplenet_kernel(x_ref,
                     w1_ref, b1_ref,
                     w2_ref, b2_ref,
                     w3_ref, b3_ref,
                     w4_ref, b4_ref,
                     w5_ref, b5_ref,
                     o_ref, *, act_dtype):
    # Per-tile bf16 cast of x (VPU has slack; avoids an extra un-fused HBM
    # round trip in the wrapper).  Matmuls: bf16 inputs, f32 MXU accumulation.
    h = x_ref[...].astype(jnp.bfloat16)

    def layer(h, w_ref, b_ref):
        acc = jnp.dot(h, w_ref[...], preferred_element_type=jnp.float32)
        acc = acc + b_ref[...]                       # f32 bias add (VPU)
        # tanh in bf16 on v6e/v7x (halves EUP work, result feeds the next MXU
        # matmul directly); f32 on v5e/older where there is no bf16 EUP path.
        return jnp.tanh(acc.astype(act_dtype)).astype(jnp.bfloat16)

    h = layer(h, w1_ref, b1_ref)
    h = layer(h, w2_ref, b2_ref)
    h = layer(h, w3_ref, b3_ref)
    h = layer(h, w4_ref, b4_ref)
    y = jnp.dot(h, w5_ref[...], preferred_element_type=jnp.float32) + b5_ref[...]
    # Only column 0 of the padded (tm, 128) result is real: store just that
    # column -> (tm, 1) block, 4 B/row of HBM writeback instead of 512 B/row.
    o_ref[...] = y[:, 0:1].astype(o_ref.dtype)


# ----------------------------------------------------------------------------
# Parameters
# ----------------------------------------------------------------------------
def init_params(key, ninputs):
    """Logical f32 params matching PyTorch nn.Linear init (U(+-1/sqrt(fan_in))).
    Weights stored transposed as (in, out) so the kernel computes y = x@W + b."""
    dims = [(ninputs, 128), (128, 128), (128, 64), (64, 64), (64, 1)]
    params = []
    for fan_in, fan_out in dims:
        key, kw, kb = jax.random.split(key, 3)
        bound = 1.0 / (fan_in ** 0.5)
        w = jax.random.uniform(kw, (fan_in, fan_out), jnp.float32, -bound, bound)
        b = jax.random.uniform(kb, (1, fan_out), jnp.float32, -bound, bound)
        params.append((w, b))
    return params


def prepare_params(params):
    """Pad + cast once (hoisted out of the forward path).

    Every layer's out-width is zero-padded to 128 lanes (lane-dense VPU/EUP
    ops, unmasked intermediate stores) and its in-dim is zero-padded to the
    PREVIOUS layer's padded out-width so every contraction matches.  Zero
    padding keeps the math exact: padded bias entries are 0, tanh(0) = 0, and
    the padded weight rows of the next layer are 0 as well.
    Weights -> bf16 (MXU inputs), biases -> f32.
    """
    kparams = []
    prev_out_pad = params[0][0].shape[0]      # layer-1 in-dim == x feature dim
    for w, b in params:
        fan_in, fan_out = w.shape
        in_pad = prev_out_pad
        out_pad = max(fan_out, _LANE)
        wp = jnp.zeros((in_pad, out_pad), jnp.float32)
        wp = wp.at[:fan_in, :fan_out].set(w).astype(jnp.bfloat16)
        bp = jnp.zeros((1, out_pad), jnp.float32).at[:, :fan_out].set(b)
        kparams.append((wp, bp))
        prev_out_pad = out_pad
    return kparams


# ----------------------------------------------------------------------------
# Wrapper
# ----------------------------------------------------------------------------
def _act_dtype():
    kind = jax.devices()[0].device_kind.lower()
    # v5e and older have no bf16 EUP/VPU path -> keep tanh in f32 there.
    if any(v in kind for v in ("v2", "v3", "v4", "v5")):
        return jnp.float32
    return jnp.bfloat16


def _pick_tm(b8, nin):
    """Batch-tile rows: >= 4 grid steps (2 per v7x TensorCore) for medium and
    large batches, tiles up to 4096 rows for very large batches, per-step VMEM
    footprint capped (safe within v7x's 64 MiB physical VMEM)."""
    if b8 <= 128:
        return b8                               # tiny batch: single grid step
    tm = 128
    while tm < 4096 and pl.cdiv(b8, tm * 2) >= 4:
        tm *= 2

    # Double-buffered f32 x tile + ~4 live f32 (tm,128) activation temps
    # + double-buffered (tm,1) f32 output.
    def footprint(t):
        return 2 * t * nin * 4 + 4 * t * _LANE * 4 + 2 * t * 4

    while tm > 128 and footprint(tm) > 20 * 1024 * 1024:
        tm //= 2
    return tm


def simplenet_forward(x, kparams, *, tm=None):
    """x: (B, ninputs) float32.  kparams: output of prepare_params()."""
    B, nin = x.shape
    assert kparams[0][0].shape[0] == nin, "params were padded for a different ninputs"

    b8 = ((B + 7) // 8) * 8                     # sublane alignment
    if tm is None:
        tm = _pick_tm(b8, nin)
    b_pad = ((b8 + tm - 1) // tm) * tm
    if b_pad // tm > 1:                         # keep the grid even (v7x: 2 TCs)
        b_pad = ((b_pad + 2 * tm - 1) // (2 * tm)) * (2 * tm)
    if b_pad != B:
        x = jnp.pad(x, ((0, b_pad - B), (0, 0)))
    # NOTE: no wrapper-side bf16 cast of x -- the cast happens per tile inside
    # the kernel, saving a full extra HBM pass over x.

    flat_params = []
    in_specs = [pl.BlockSpec((tm, nin), lambda i: (i, 0))]
    for w, b in kparams:
        flat_params += [w, b]
        # Constant index_map: weights/biases are DMA'd once and stay resident
        # in VMEM for the whole batch grid.  (pipeline_mode=pl.Buffered(1)
        # would save their ~140 KB double buffer; kept default for portability.)
        in_specs.append(pl.BlockSpec(w.shape, lambda i: (0, 0)))
        in_specs.append(pl.BlockSpec(b.shape, lambda i: (0, 0)))

    kernel = functools.partial(simplenet_kernel, act_dtype=_act_dtype())

    out = pl.pallas_call(
        kernel,
        out_shape=jax.ShapeDtypeStruct((b_pad, 1), jnp.float32),
        grid_spec=pltpu.PrefetchScalarGridSpec(
            num_scalar_prefetch=0,
            grid=(b_pad // tm,),
            in_specs=in_specs,
            out_specs=pl.BlockSpec((tm, 1), lambda i: (i, 0)),
        ),
        compiler_params=pltpu.CompilerParams(
            dimension_semantics=("parallel",),
            vmem_limit_bytes=32 * 1024 * 1024,
        ),
    )(x, *flat_params)

    return out[:B]


# ----------------------------------------------------------------------------
# Pure-JAX f32 reference (PyTorch semantics)
# ----------------------------------------------------------------------------
def simplenet_ref(x, params):
    h = x
    for i, (w, b) in enumerate(params):
        h = h @ w + b
        if i < len(params) - 1:
            h = jnp.tanh(h)
    return h


if __name__ == "__main__":
    key = jax.random.PRNGKey(0)
    ninputs = 32
    batch = 8

    kx, kp = jax.random.split(key)
    x = jax.random.normal(kx, (batch, ninputs), jnp.float32)
    params = init_params(kp, ninputs)
    kparams = prepare_params(params)       # pad/cast hoisted out of the forward

    out = jax.block_until_ready(simplenet_forward(x, kparams))
    ref = simplenet_ref(x, params)

    assert out.shape == (batch, 1), out.shape
    # bf16 matmul inputs / activations with f32 accumulation -> loose tolerance.
    err = float(jnp.max(jnp.abs(out - ref)))
    assert jnp.allclose(out, ref, atol=5e-2, rtol=5e-2), f"max abs err {err}"

    print("KERNEL_OK")
</pallas_src>

<mosaic_0001>
module attributes {stable_mosaic.version = 11 : i64} {
  func.func @simplenet_kernel(%arg0: i32, %arg1: memref<8x32xf32, #tpu.memory_space<vmem>>, %arg2: memref<32x128xbf16, #tpu.memory_space<vmem>>, %arg3: memref<1x128xf32, #tpu.memory_space<vmem>>, %arg4: memref<128x128xbf16, #tpu.memory_space<vmem>>, %arg5: memref<1x128xf32, #tpu.memory_space<vmem>>, %arg6: memref<128x128xbf16, #tpu.memory_space<vmem>>, %arg7: memref<1x128xf32, #tpu.memory_space<vmem>>, %arg8: memref<128x128xbf16, #tpu.memory_space<vmem>>, %arg9: memref<1x128xf32, #tpu.memory_space<vmem>>, %arg10: memref<128x128xbf16, #tpu.memory_space<vmem>>, %arg11: memref<1x128xf32, #tpu.memory_space<vmem>>, %arg12: memref<8x1xf32, #tpu.memory_space<vmem>>) attributes {dimension_semantics = [#tpu.dimension_semantics<parallel>], iteration_bounds = array<i64: 1>, scalar_prefetch = 0 : i64, scratch_operands = 0 : i64, tpu.core_type = #tpu.core_type<tc>, window_params = [{transform_indices = @transform_0, window_bounds = array<i64: 8, 32>}, {pipeline_mode = #tpu.pipeline_mode<synchronous>, transform_indices = @transform_1, window_bounds = array<i64: 32, 128>}, {pipeline_mode = #tpu.pipeline_mode<synchronous>, transform_indices = @transform_2, window_bounds = array<i64: 1, 128>}, {pipeline_mode = #tpu.pipeline_mode<synchronous>, transform_indices = @transform_3, window_bounds = array<i64: 128, 128>}, {pipeline_mode = #tpu.pipeline_mode<synchronous>, transform_indices = @transform_4, window_bounds = array<i64: 1, 128>}, {pipeline_mode = #tpu.pipeline_mode<synchronous>, transform_indices = @transform_5, window_bounds = array<i64: 128, 128>}, {pipeline_mode = #tpu.pipeline_mode<synchronous>, transform_indices = @transform_6, window_bounds = array<i64: 1, 128>}, {pipeline_mode = #tpu.pipeline_mode<synchronous>, transform_indices = @transform_7, window_bounds = array<i64: 128, 128>}, {pipeline_mode = #tpu.pipeline_mode<synchronous>, transform_indices = @transform_8, window_bounds = array<i64: 1, 128>}, {pipeline_mode = #tpu.pipeline_mode<synchronous>, transform_indices = @transform_9, window_bounds = array<i64: 128, 128>}, {pipeline_mode = #tpu.pipeline_mode<synchronous>, transform_indices = @transform_10, window_bounds = array<i64: 1, 128>}, {transform_indices = @transform_11, window_bounds = array<i64: 8, 1>}]} {
    %c0 = arith.constant 0 : index
    %c0_0 = arith.constant 0 : index
    %0 = vector.load %arg1[%c0, %c0_0] : memref<8x32xf32, #tpu.memory_space<vmem>>, vector<8x32xf32>
    %1 = arith.truncf %0 : vector<8x32xf32> to vector<8x32xbf16>
    %c0_1 = arith.constant 0 : index
    %c0_2 = arith.constant 0 : index
    %2 = vector.load %arg2[%c0_1, %c0_2] : memref<32x128xbf16, #tpu.memory_space<vmem>>, vector<32x128xbf16>
    %cst = arith.constant dense<0.000000e+00> : vector<8x128xf32>
    %3 = tpu.matmul %1, %2, %cst {dimension_numbers = #tpu.dot_dimension_numbers<[1], [0], [0], [1], [0, 0, 1, 1], [], []>} : vector<8x32xbf16>, vector<32x128xbf16>, vector<8x128xf32> -> vector<8x128xf32>
    %c0_3 = arith.constant 0 : index
    %c0_4 = arith.constant 0 : index
    %4 = vector.load %arg3[%c0_3, %c0_4] : memref<1x128xf32, #tpu.memory_space<vmem>>, vector<1x128xf32>
    %5 = vector.broadcast %4 : vector<1x128xf32> to vector<8x128xf32>
    %6 = arith.addf %3, %5 : vector<8x128xf32>
    %7 = arith.truncf %6 : vector<8x128xf32> to vector<8x128xbf16>
    %8 = math.tanh %7 : vector<8x128xbf16>
    %c0_5 = arith.constant 0 : index
    %c0_6 = arith.constant 0 : index
    %9 = vector.load %arg4[%c0_5, %c0_6] : memref<128x128xbf16, #tpu.memory_space<vmem>>, vector<128x128xbf16>
    %cst_7 = arith.constant dense<0.000000e+00> : vector<8x128xf32>
    %10 = tpu.matmul %8, %9, %cst_7 {dimension_numbers = #tpu.dot_dimension_numbers<[1], [0], [0], [1], [0, 0, 1, 1], [], []>} : vector<8x128xbf16>, vector<128x128xbf16>, vector<8x128xf32> -> vector<8x128xf32>
    %c0_8 = arith.constant 0 : index
    %c0_9 = arith.constant 0 : index
    %11 = vector.load %arg5[%c0_8, %c0_9] : memref<1x128xf32, #tpu.memory_space<vmem>>, vector<1x128xf32>
    %12 = vector.broadcast %11 : vector<1x128xf32> to vector<8x128xf32>
    %13 = arith.addf %10, %12 : vector<8x128xf32>
    %14 = arith.truncf %13 : vector<8x128xf32> to vector<8x128xbf16>
    %15 = math.tanh %14 : vector<8x128xbf16>
    %c0_10 = arith.constant 0 : index
    %c0_11 = arith.constant 0 : index
    %16 = vector.load %arg6[%c0_10, %c0_11] : memref<128x128xbf16, #tpu.memory_space<vmem>>, vector<128x128xbf16>
    %cst_12 = arith.constant dense<0.000000e+00> : vector<8x128xf32>
    %17 = tpu.matmul %15, %16, %cst_12 {dimension_numbers = #tpu.dot_dimension_numbers<[1], [0], [0], [1], [0, 0, 1, 1], [], []>} : vector<8x128xbf16>, vector<128x128xbf16>, vector<8x128xf32> -> vector<8x128xf32>
    %c0_13 = arith.constant 0 : index
    %c0_14 = arith.constant 0 : index
    %18 = vector.load %arg7[%c0_13, %c0_14] : memref<1x128xf32, #tpu.memory_space<vmem>>, vector<1x128xf32>
    %19 = vector.broadcast %18 : vector<1x128xf32> to vector<8x128xf32>
    %20 = arith.addf %17, %19 : vector<8x128xf32>
    %21 = arith.truncf %20 : vector<8x128xf32> to vector<8x128xbf16>
    %22 = math.tanh %21 : vector<8x128xbf16>
    %c0_15 = arith.constant 0 : index
    %c0_16 = arith.constant 0 : index
    %23 = vector.load %arg8[%c0_15, %c0_16] : memref<128x128xbf16, #tpu.memory_space<vmem>>, vector<128x128xbf16>
    %cst_17 = arith.constant dense<0.000000e+00> : vector<8x128xf32>
    %24 = tpu.matmul %22, %23, %cst_17 {dimension_numbers = #tpu.dot_dimension_numbers<[1], [0], [0], [1], [0, 0, 1, 1], [], []>} : vector<8x128xbf16>, vector<128x128xbf16>, vector<8x128xf32> -> vector<8x128xf32>
    %c0_18 = arith.constant 0 : index
    %c0_19 = arith.constant 0 : index
    %25 = vector.load %arg9[%c0_18, %c0_19] : memref<1x128xf32, #tpu.memory_space<vmem>>, vector<1x128xf32>
    %26 = vector.broadcast %25 : vector<1x128xf32> to vector<8x128xf32>
    %27 = arith.addf %24, %26 : vector<8x128xf32>
    %28 = arith.truncf %27 : vector<8x128xf32> to vector<8x128xbf16>
    %29 = math.tanh %28 : vector<8x128xbf16>
    %c0_20 = arith.constant 0 : index
    %c0_21 = arith.constant 0 : index
    %30 = vector.load %arg10[%c0_20, %c0_21] : memref<128x128xbf16, #tpu.memory_space<vmem>>, vector<128x128xbf16>
    %cst_22 = arith.constant dense<0.000000e+00> : vector<8x128xf32>
    %31 = tpu.matmul %29, %30, %cst_22 {dimension_numbers = #tpu.dot_dimension_numbers<[1], [0], [0], [1], [0, 0, 1, 1], [], []>} : vector<8x128xbf16>, vector<128x128xbf16>, vector<8x128xf32> -> vector<8x128xf32>
    %c0_23 = arith.constant 0 : index
    %c0_24 = arith.constant 0 : index
    %32 = vector.load %arg11[%c0_23, %c0_24] : memref<1x128xf32, #tpu.memory_space<vmem>>, vector<1x128xf32>
    %33 = vector.broadcast %32 : vector<1x128xf32> to vector<8x128xf32>
    %34 = arith.addf %31, %33 : vector<8x128xf32>
    %35 = vector.extract_strided_slice %34 {offsets = [0, 0], sizes = [8, 1], strides = [1, 1]} : vector<8x128xf32> to vector<8x1xf32>
    %c0_25 = arith.constant 0 : index
    %c0_26 = arith.constant 0 : index
    %36 = vector.load %arg12[%c0_25, %c0_26] : memref<8x1xf32, #tpu.memory_space<vmem>>, vector<8x1xf32>
    tpu.vector_store %arg12[%c0_25, %c0_26], %35 {strides = array<i32>} : memref<8x1xf32, #tpu.memory_space<vmem>>, vector<8x1xf32>,
    return
  }
  func.func @transform_0(%arg0: i32) -> (i32, i32) {
    %c0_i32 = arith.constant 0 : i32
    %c0_i32_0 = arith.constant 0 : i32
    return %arg0, %c0_i32 : i32, i32
  }
  func.func @transform_1(%arg0: i32) -> (i32, i32) {
    %c0_i32 = arith.constant 0 : i32
    %c0_i32_0 = arith.constant 0 : i32
    %c0_i32_1 = arith.constant 0 : i32
    return %c0_i32, %c0_i32_0 : i32, i32
  }
  func.func @transform_2(%arg0: i32) -> (i32, i32) {
    %c0_i32 = arith.constant 0 : i32
    %c0_i32_0 = arith.constant 0 : i32
    %c0_i32_1 = arith.constant 0 : i32
    return %c0_i32, %c0_i32_0 : i32, i32
  }
  func.func @transform_3(%arg0: i32) -> (i32, i32) {
    %c0_i32 = arith.constant 0 : i32
    %c0_i32_0 = arith.constant 0 : i32
    %c0_i32_1 = arith.constant 0 : i32
    return %c0_i32, %c0_i32_0 : i32, i32
  }
  func.func @transform_4(%arg0: i32) -> (i32, i32) {
    %c0_i32 = arith.constant 0 : i32
    %c0_i32_0 = arith.constant 0 : i32
    %c0_i32_1 = arith.constant 0 : i32
    return %c0_i32, %c0_i32_0 : i32, i32
  }
  func.func @transform_5(%arg0: i32) -> (i32, i32) {
    %c0_i32 = arith.constant 0 : i32
    %c0_i32_0 = arith.constant 0 : i32
    %c0_i32_1 = arith.constant 0 : i32
    return %c0_i32, %c0_i32_0 : i32, i32
  }
  func.func @transform_6(%arg0: i32) -> (i32, i32) {
    %c0_i32 = arith.constant 0 : i32
    %c0_i32_0 = arith.constant 0 : i32
    %c0_i32_1 = arith.constant 0 : i32
    return %c0_i32, %c0_i32_0 : i32, i32
  }
  func.func @transform_7(%arg0: i32) -> (i32, i32) {
    %c0_i32 = arith.constant 0 : i32
    %c0_i32_0 = arith.constant 0 : i32
    %c0_i32_1 = arith.constant 0 : i32
    return %c0_i32, %c0_i32_0 : i32, i32
  }
  func.func @transform_8(%arg0: i32) -> (i32, i32) {
    %c0_i32 = arith.constant 0 : i32
    %c0_i32_0 = arith.constant 0 : i32
    %c0_i32_1 = arith.constant 0 : i32
    return %c0_i32, %c0_i32_0 : i32, i32
  }
  func.func @transform_9(%arg0: i32) -> (i32, i32) {
    %c0_i32 = arith.constant 0 : i32
    %c0_i32_0 = arith.constant 0 : i32
    %c0_i32_1 = arith.constant 0 : i32
    return %c0_i32, %c0_i32_0 : i32, i32
  }
  func.func @transform_10(%arg0: i32) -> (i32, i32) {
    %c0_i32 = arith.constant 0 : i32
    %c0_i32_0 = arith.constant 0 : i32
    %c0_i32_1 = arith.constant 0 : i32
    return %c0_i32, %c0_i32_0 : i32, i32
  }
  func.func @transform_11(%arg0: i32) -> (i32, i32) {
    %c0_i32 = arith.constant 0 : i32
    %c0_i32_0 = arith.constant 0 : i32
    return %arg0, %c0_i32 : i32, i32
  }
}

</mosaic_0001>

<bundles_post_ra>
// kernel: tpu_custom_call.1
= control target key start
LH: loop header
LB: loop body
LE: loop exit
PB: predicated region body
PF: predicated region fallthrough
CT: control target
= control target key end

     0   :  { %16 = vsyncpa [#allocation3], 0  ;;  %s1228_s0 = inlined_call_operand.hbm [shape: f32[8,32], index: 0, kind: input, shape index: {}]   ;;  %s1229_s1 = inlined_call_operand.hbm [shape: bf16[32,128], index: 1, kind: input, shape index: {}]   ;;  %s1230_s2 = inlined_call_operand.vmem [shape: f32[1,128], index: 2, kind: input, shape index: {}]   ;;  %s1231_s3 = inlined_call_operand.hbm [shape: bf16[128,128], index: 3, kind: input, shape index: {}]   ;;  %s1232_s4 = inlined_call_operand.vmem [shape: f32[1,128], index: 4, kind: input, shape index: {}]   ;;  %s1233_s5 = inlined_call_operand.hbm [shape: bf16[128,128], index: 5, kind: input, shape index: {}]   ;;  %s1234_s6 = inlined_call_operand.vmem [shape: f32[1,128], index: 6, kind: input, shape index: {}]   ;;  %s1235_s7 = inlined_call_operand.hbm [shape: bf16[128,128], index: 7, kind: input, shape index: {}]   ;;  %s1236_s8 = inlined_call_operand.vmem [shape: f32[1,128], index: 8, kind: input, shape index: {}]   ;;  %s1237_s9 = inlined_call_operand.hbm [shape: bf16[128,128], index: 9, kind: input, shape index: {}]   ;;  %s1238_s10 = inlined_call_operand.vmem [shape: f32[1,128], index: 10, kind: input, shape index: {}]   ;;  %s1239_s11 = inlined_call_operand.vmem [shape: f32[8,1], index: 11, kind: output, shape index: {}]  }
   0x1   :  { %17 = vsyncpa [#allocation5], 0 }
   0x2   :  { %18 = vsyncpa [#allocation8], 0 }
   0x3   :  { %19 = vsyncpa [#allocation11], 0  ;;  %s1009_s17 = smov [#allocation4]   ;;  %s869_s21 = scalar_lea.hbm %s1229_s1, 256 }
   0x4   :  { %s35_s18 = sshll.u32 %s1009_s17, 4  ;;  %p870_p0 = scmp.ne.s32.totalorder %s1229_s1, %s869_s21  ;;  %s36_s18 = int_to_ptr.vmem [resolvable:$true] %s35_s18 }
   0x5   :  { %p873_p1 = scmp.lt.u32.totalorder %s869_s21, %s1229_s1 }
   0x7   :  { %p875_p2 = pnand %p873_p1, %p870_p0 }
   0x9   :  { %878 = shalt.err (!%p875_p2)
}
   0xa   :  { %s879_s26 = scalar_lea.vmem %s36_s18, 256  ;;  %p884_p4 = scmp.lt.s32.totalorder %s36_s18, %s36_s18 }
   0xb   :  { %p880_p3 = scmp.ne.s32.totalorder %s36_s18, %s879_s26  ;;  %p885_p5 = scmp.lt.s32.totalorder %s879_s26, %s879_s26 }
   0xd   :  { %p886_p6 = por %p885_p5, %p884_p4 }
   0xf   :  { %p887_p7 = pnand %p886_p6, %p880_p3 }
  0x11   :  { %890 = shalt.err (!%p887_p7)
}
  0x12   :  { %s1010_s27 = smov 64   ;;  %s1011_s28 = smov 4  }
  0x13   :  { %41 = dma.hbm_to_vmem [thread:$0]  %s1229_s1, 256, %s36_s18, [#allocation5], %s1010_s27, %s1010_s27, %s1011_s28  }
  0x14   :  { %s1012_s12 = smov [#allocation7]   ;;  %s1013_s14 = smov [#allocation2]  }
  0x15   :  { %s63_s13 = sshll.u32 %s1012_s12, 4  ;;  %s26_s15 = sshll.u32 %s1013_s14, 4  ;;  %s64_s13 = int_to_ptr.vmem [resolvable:$true] %s63_s13  ;;  %s27_s15 = int_to_ptr.vmem [resolvable:$true] %s26_s15 }
  0x16   :  { %s891_s19 = scalar_lea.hbm %s1233_s5, 1024 }
  0x17   :  { %p892_p8 = scmp.ne.s32.totalorder %s1233_s5, %s891_s19  ;;  %p895_p9 = scmp.lt.u32.totalorder %s891_s19, %s1233_s5 }
  0x19   :  { %p897_p10 = pnand %p895_p9, %p892_p8 }
  0x1b   :  { %900 = shalt.err (!%p897_p10)
}
  0x1c   :  { %s901_s1 = scalar_lea.vmem %s64_s13, 1024  ;;  %p906_p12 = scmp.lt.s32.totalorder %s64_s13, %s64_s13 }
  0x1d   :  { %p902_p11 = scmp.ne.s32.totalorder %s64_s13, %s901_s1  ;;  %p907_p13 = scmp.lt.s32.totalorder %s901_s1, %s901_s1 }
  0x1f   :  { %p908_p0 = por %p907_p13, %p906_p12 }
  0x21   :  { %p909_p1 = pnand %p908_p0, %p902_p11 }
  0x23   :  { %912 = shalt.err (!%p909_p1)
}
  0x24   :  { %69 = dma.hbm_to_vmem [thread:$0]  %s1233_s5, 1024, %s64_s13, [#allocation8], %s1010_s27, %s1010_s27, %s1011_s28  }
  0x25   :  { %s913_s29 = scalar_lea.hbm %s1228_s0, 128 }
  0x26   :  { %p914_p2 = scmp.ne.s32.totalorder %s1228_s0, %s913_s29  ;;  %p917_p3 = scmp.lt.u32.totalorder %s913_s29, %s1228_s0 }
  0x28   :  { %p919_p4 = pnand %p917_p3, %p914_p2 }
  0x2a   :  { %922 = shalt.err (!%p919_p4)
}
  0x2b   :  { %s923_s17 = scalar_lea.vmem %s27_s15, 128  ;;  %p928_p6 = scmp.lt.s32.totalorder %s27_s15, %s27_s15 }
  0x2c   :  { %p924_p5 = scmp.ne.s32.totalorder %s27_s15, %s923_s17  ;;  %p929_p7 = scmp.lt.s32.totalorder %s923_s17, %s923_s17 }
  0x2e   :  { %p930_p8 = por %p929_p7, %p928_p6 }
  0x30   :  { %p931_p9 = pnand %p930_p8, %p924_p5 }
  0x32   :  { %934 = shalt.err (!%p931_p9)
}
  0x33   :  { %29 = dma.hbm_to_vmem [thread:$0]  %s1228_s0, 128, %s27_s15, [#allocation3]  }
  0x34   :  { %s1014_s19 = smov [#allocation6]   ;;  %s1015_s21 = smov [#allocation9]  }
  0x35   :  { %s49_s20 = sshll.u32 %s1014_s19, 4  ;;  %s77_s22 = sshll.u32 %s1015_s21, 4  ;;  %s50_s20 = int_to_ptr.vmem [resolvable:$true] %s49_s20  ;;  %s78_s22 = int_to_ptr.vmem [resolvable:$true] %s77_s22 }
  0x36   :  { %s935_s18 = scalar_lea.hbm %s1231_s3, 1024 }
  0x37   :  { %p936_p10 = scmp.ne.s32.totalorder %s1231_s3, %s935_s18  ;;  %p939_p11 = scmp.lt.u32.totalorder %s935_s18, %s1231_s3 }
  0x39   :  { %p941_p12 = pnand %p939_p11, %p936_p10 }
  0x3b   :  { %944 = shalt.err (!%p941_p12)
}
  0x3c   :  { %s945_s0 = scalar_lea.vmem %s50_s20, 1024  ;;  %p950_p0 = scmp.lt.s32.totalorder %s50_s20, %s50_s20 }
  0x3d   :  { %p946_p13 = scmp.ne.s32.totalorder %s50_s20, %s945_s0  ;;  %p951_p1 = scmp.lt.s32.totalorder %s945_s0, %s945_s0 }
  0x3f   :  { %p952_p2 = por %p951_p1, %p950_p0 }
  0x41   :  { %p953_p3 = pnand %p952_p2, %p946_p13 }
  0x43   :  { %956 = shalt.err (!%p953_p3)
}
  0x44   :  { %55 = dma.hbm_to_vmem [thread:$0]  %s1231_s3, 1024, %s50_s20, [#allocation5], %s1010_s27, %s1010_s27, %s1011_s28  }
  0x45   :  { %s957_s16 = scalar_lea.hbm %s1235_s7, 1024 }
  0x46   :  { %p958_p4 = scmp.ne.s32.totalorder %s1235_s7, %s957_s16  ;;  %p961_p5 = scmp.lt.u32.totalorder %s957_s16, %s1235_s7 }
  0x48   :  { %p963_p6 = pnand %p961_p5, %p958_p4 }
  0x4a   :  { %966 = shalt.err (!%p963_p6)
}
  0x4b   :  { %s967_s21 = scalar_lea.vmem %s78_s22, 1024  ;;  %p972_p8 = scmp.lt.s32.totalorder %s78_s22, %s78_s22 }
  0x4c   :  { %p968_p7 = scmp.ne.s32.totalorder %s78_s22, %s967_s21  ;;  %p973_p9 = scmp.lt.s32.totalorder %s967_s21, %s967_s21 }
  0x4e   :  { %p974_p10 = por %p973_p9, %p972_p8 }
  0x50   :  { %p975_p11 = pnand %p974_p10, %p968_p7 }
  0x52   :  { %978 = shalt.err (!%p975_p11)
}
  0x53   :  { %83 = dma.hbm_to_vmem [thread:$0]  %s1235_s7, 1024, %s78_s22, [#allocation8], %s1010_s27, %s1010_s27, %s1011_s28  }
  0x54   :  { %s1016_s23 = smov [#allocation10]   ;;  %s979_s25 = scalar_lea.hbm %s1237_s9, 1024 }
  0x55   :  { %s91_s1 = sshll.u32 %s1016_s23, 4  ;;  %p980_p12 = scmp.ne.s32.totalorder %s1237_s9, %s979_s25  ;;  %s92_s1 = int_to_ptr.vmem [resolvable:$true] %s91_s1 }
  0x56   :  { %p983_p13 = scmp.lt.u32.totalorder %s979_s25, %s1237_s9 }
  0x58   :  { %p985_p0 = pnand %p983_p13, %p980_p12 }
  0x5a   :  { %988 = shalt.err (!%p985_p0)
}
  0x5b   :  { %s989_s30 = scalar_lea.vmem %s92_s1, 1024  ;;  %p994_p2 = scmp.lt.s32.totalorder %s92_s1, %s92_s1 }
  0x5c   :  { %p990_p1 = scmp.ne.s32.totalorder %s92_s1, %s989_s30  ;;  %p995_p3 = scmp.lt.s32.totalorder %s989_s30, %s989_s30 }
  0x5e   :  { %p996_p4 = por %p995_p3, %p994_p2 }
  0x60   :  { %p997_p5 = pnand %p996_p4, %p990_p1 }
  0x62   :  { %1000 = shalt.err (!%p997_p5)
}
  0x63   :  { %97 = dma.hbm_to_vmem [thread:$0]  %s1237_s9, 1024, %s92_s1, [#allocation11], %s1010_s27, %s1010_s27, %s1011_s28  }
  0x64   :  { %1001 = dma.done.wait [#allocation3], 128  }
  0x65   :  { %1002 = vsyncadd [#allocation3], 4294967168 }
  0x66   :  { %1003 = dma.done.wait [#allocation5], 1280  }
  0x67   :  { %1004 = vsyncadd [#allocation5], 4294966016 }
  0x68   :  { %1005 = dma.done.wait [#allocation8], 2048  }
  0x69   :  { %1006 = vsyncadd [#allocation8], 4294965248 }
  0x6a   :  { %1007 = dma.done.wait [#allocation11], 1024  }
  0x6b   :  { %1008 = vsyncadd [#allocation11], 4294966272  ;;  %v1017_v0 = vmov 0.0   ;;  %vm1018_vm0 = vmmov 0   ;;  %v827_v1 = vld [vmem:[#allocation4] sm:$0xff]   ;;  %v828_v2 = vld [vmem:[#allocation4 + $0x8] sm:$0xff]  }
  0x6c   :  { %729 = vmatprep.subr.bf16.mxu0 %v1017_v0  ;;  %733 = vmatprep.mubr.msk.bf16.mxu0 %vm1018_vm0, %v1017_v0  ;;  %v119_v3 = vld [vmem:[#allocation2] sm:$0xff]  ;;  %v829_v4 = vld [vmem:[#allocation6] sm:$0xff]   ;;  %vm144_vm1 = vcmask 261120   ;;  %v831_v7 = vld [vmem:[#allocation6 + $0x10] sm:$0xff]   ;;  %vm640_vm2 = vcmask 7168  }
  0x6d   :  { %737 = vmatprep.subr.bf16.mxu1 %v1017_v0  ;;  %753 = vmatprep.mubr.msk.bf16.mxu1 %vm1018_vm0, %v1017_v0  ;;  %v120_v5 = vpack.c.bf16 %v119_v3, %v119_v3  ;;  %v830_v6 = vld [vmem:[#allocation6 + $0x8] sm:$0xff]   ;;  %v832_v8 = vld [vmem:[#allocation6 + $0x18] sm:$0xff]   ;;  %v833_v9 = vld [vmem:[#allocation6 + $0x20] sm:$0xff]  }
  0x6e   :  { %730 = vmatpush3.bf16.msra.mxu0 %v827_v1  ;;  %738 = vmatpush3.bf16.msra.mxu1 %v829_v4  ;;  %v834_v10 = vld [vmem:[#allocation6 + $0x28] sm:$0xff]   ;;  %v835_v11 = vld [vmem:[#allocation6 + $0x30] sm:$0xff]   ;;  %v836_v12 = vld [vmem:[#allocation6 + $0x38] sm:$0xff]  }
  0x6f   :  { %731 = vmatprep.subr.bf16.mxu0 %v1017_v0  ;;  %739 = vmatprep.subr.bf16.mxu1 %v1017_v0  ;;  %v837_v13 = vld [vmem:[#allocation7] sm:$0xff]   ;;  %v838_v14 = vld [vmem:[#allocation7 + $0x8] sm:$0xff]   ;;  %v839_v15 = vld [vmem:[#allocation7 + $0x10] sm:$0xff]  }
  0x70   :  { %v840_v16 = vld [vmem:[#allocation7 + $0x18] sm:$0xff]   ;;  %v650_v17 = vld [vmem:[%s1230_s2] ss:$0 sm:$0xff]  ;;  %v842_v26 = vld [vmem:[#allocation7 + $0x28] sm:$0xff]  }
  0x71   :  { %v841_v25 = vld [vmem:[#allocation7 + $0x20] sm:$0xff]   ;;  %v843_v27 = vld [vmem:[#allocation7 + $0x30] sm:$0xff]   ;;  %v844_v28 = vld [vmem:[#allocation7 + $0x38] sm:$0xff]  }
  0x72   :  { %732 = vmatpush3.bf16.msra.mxu0 %v828_v2  ;;  %740 = vmatpush3.bf16.msra.mxu1 %v830_v6  ;;  %v845_v29 = vld [vmem:[#allocation9] sm:$0xff]   ;;  %v846_v30 = vld [vmem:[#allocation9 + $0x8] sm:$0xff]   ;;  %v847_v31 = vld [vmem:[#allocation9 + $0x10] sm:$0xff]  }
  0x73   :  { %757 = vmatprep.subr.bf16.mxu0 %v1017_v0  ;;  %741 = vmatprep.subr.bf16.mxu1 %v1017_v0  ;;  %v848_v32 = vld [vmem:[#allocation9 + $0x18] sm:$0xff]   ;;  %v654_v33 = vld [vmem:[%s1232_s4] ss:$0 sm:$0xff]  ;;  %v850_v42 = vld [vmem:[#allocation9 + $0x28] sm:$0xff]  }
  0x74   :  { %v849_v41 = vld [vmem:[#allocation9 + $0x20] sm:$0xff]   ;;  %v851_v43 = vld [vmem:[#allocation9 + $0x30] sm:$0xff]   ;;  %v852_v44 = vld [vmem:[#allocation9 + $0x38] sm:$0xff]  }
  0x75   :  { %734 = vmatmul.mubr.msk.bf16.vlgmr.msra.gmra.mrb[0].mxu0 %vm144_vm1, %v120_v5  ;;  %v853_v45 = vld [vmem:[#allocation10] sm:$0xff]   ;;  %v854_v46 = vld [vmem:[#allocation10 + $0x8] sm:$0xff]   ;;  %v855_v47 = vld [vmem:[#allocation10 + $0x10] sm:$0xff]  }
  0x76   :  { %773 = vmatprep.mubr.msk.bf16.mxu0 %vm1018_vm0, %v1017_v0  ;;  %742 = vmatpush3.bf16.msra.mxu1 %v831_v7  ;;  %v856_v48 = vld [vmem:[#allocation10 + $0x18] sm:$0xff]   ;;  %v663_v49 = vld [vmem:[%s1234_s6] ss:$0 sm:$0xff]  ;;  %v858_v58 = vld [vmem:[#allocation10 + $0x28] sm:$0xff]  }
  0x77   :  { %743 = vmatprep.subr.bf16.mxu1 %v1017_v0  ;;  %758 = vmatpush3.bf16.msra.mxu0 %v837_v13  ;;  %v857_v57 = vld [vmem:[#allocation10 + $0x20] sm:$0xff]   ;;  %v859_v59 = vld [vmem:[#allocation10 + $0x30] sm:$0xff]   ;;  %v860_v60 = vld [vmem:[#allocation10 + $0x38] sm:$0xff]  }
  0x78   :  { %759 = vmatprep.subr.bf16.mxu0 %v1017_v0  ;;  %v672_v61 = vld [vmem:[%s1236_s8] ss:$0 sm:$0xff] }
  0x79   :  { %v681_v6 = vld [vmem:[%s1238_s10] ss:$0 sm:$0xff] }
  0x7a   :  { %744 = vmatpush3.bf16.msra.mxu1 %v832_v8 }
  0x7b   :  { %745 = vmatprep.subr.bf16.mxu1 %v1017_v0  ;;  %760 = vmatpush3.bf16.msra.mxu0 %v838_v14 }
  0x7c   :  { %761 = vmatprep.subr.bf16.mxu0 %v1017_v0 }
  0x7e   :  { %746 = vmatpush3.bf16.msra.mxu1 %v833_v9 }
  0x7f   :  { %747 = vmatprep.subr.bf16.mxu1 %v1017_v0  ;;  %762 = vmatpush3.bf16.msra.mxu0 %v839_v15 }
  0x80   :  { %763 = vmatprep.subr.bf16.mxu0 %v1017_v0 }
  0x82   :  { %748 = vmatpush3.bf16.msra.mxu1 %v834_v10 }
  0x83   :  { %749 = vmatprep.subr.bf16.mxu1 %v1017_v0  ;;  %764 = vmatpush3.bf16.msra.mxu0 %v840_v16 }
  0x84   :  { %765 = vmatprep.subr.bf16.mxu0 %v1017_v0 }
  0x86   :  { %750 = vmatpush3.bf16.msra.mxu1 %v835_v11 }
  0x87   :  { %751 = vmatprep.subr.bf16.mxu1 %v1017_v0  ;;  %766 = vmatpush3.bf16.msra.mxu0 %v841_v25 }
  0x88   :  { %767 = vmatprep.subr.bf16.mxu0 %v1017_v0 }
  0x8a   :  { %752 = vmatpush3.bf16.msra.mxu1 %v836_v12 }
  0x8b   :  { %777 = vmatprep.subr.bf16.mxu1 %v1017_v0  ;;  %768 = vmatpush3.bf16.msra.mxu0 %v842_v26 }
  0x8c   :  { %769 = vmatprep.subr.bf16.mxu0 %v1017_v0 }
  0x8f   :  { %770 = vmatpush3.bf16.msra.mxu0 %v843_v27 }
  0x90   :  { %771 = vmatprep.subr.bf16.mxu0 %v1017_v0 }
  0x93   :  { %772 = vmatpush3.bf16.msra.mxu0 %v844_v28 }
  0x94   :  { %797 = vmatprep.subr.bf16.mxu0 %v1017_v0 }
 0x148   :  { %v182_v18 = vpop.f32.mrb[0].mxu0 }
 0x149   :  { %v183_v19 = vadd.f32 %v650_v17, %v182_v18  ;;  %v735_v20 = vpop.f32.mrb[1].mxu0 }
 0x14a   :  { %v185_v21 = vpop.f32.mrb[2].mxu0 }
 0x14b   :  { %v188_v22 = vpack.c.bf16 %v183_v19, %v183_v19  ;;  %v736_v23 = vpop.f32.mrb[3].mxu0 }
 0x14d   :  { %861 = vtanh.bf16 %v188_v22 }
 0x158   :  { %v862_v24 = vpop.eup %861 }
 0x159   :  { %754 = vmatmul.mubr.bf16.vlgmr.msra.gmra.mrb[0].mxu1 %v862_v24 }
 0x15a   :  { %793 = vmatprep.mubr.msk.bf16.mxu1 %vm1018_vm0, %v1017_v0  ;;  %778 = vmatpush3.bf16.msra.mxu1 %v845_v29 }
 0x15b   :  { %779 = vmatprep.subr.bf16.mxu1 %v1017_v0 }
 0x15e   :  { %780 = vmatpush3.bf16.msra.mxu1 %v846_v30 }
 0x15f   :  { %781 = vmatprep.subr.bf16.mxu1 %v1017_v0 }
 0x162   :  { %782 = vmatpush3.bf16.msra.mxu1 %v847_v31 }
 0x163   :  { %783 = vmatprep.subr.bf16.mxu1 %v1017_v0 }
 0x166   :  { %784 = vmatpush3.bf16.msra.mxu1 %v848_v32 }
 0x167   :  { %785 = vmatprep.subr.bf16.mxu1 %v1017_v0 }
 0x16a   :  { %786 = vmatpush3.bf16.msra.mxu1 %v849_v41 }
 0x16b   :  { %787 = vmatprep.subr.bf16.mxu1 %v1017_v0 }
 0x16e   :  { %788 = vmatpush3.bf16.msra.mxu1 %v850_v42 }
 0x16f   :  { %789 = vmatprep.subr.bf16.mxu1 %v1017_v0 }
 0x172   :  { %790 = vmatpush3.bf16.msra.mxu1 %v851_v43 }
 0x173   :  { %791 = vmatprep.subr.bf16.mxu1 %v1017_v0 }
 0x176   :  { %792 = vmatpush3.bf16.msra.mxu1 %v852_v44 }
 0x22c   :  { %v295_v34 = vpop.f32.mrb[0].mxu1 }
 0x22d   :  { %v296_v35 = vadd.f32 %v654_v33, %v295_v34  ;;  %v755_v36 = vpop.f32.mrb[1].mxu1 }
 0x22e   :  { %v298_v37 = vpop.f32.mrb[2].mxu1 }
 0x22f   :  { %v301_v38 = vpack.c.bf16 %v296_v35, %v296_v35  ;;  %v756_v39 = vpop.f32.mrb[3].mxu1 }
 0x231   :  { %863 = vtanh.bf16 %v301_v38 }
 0x23c   :  { %v864_v40 = vpop.eup %863 }
 0x23d   :  { %774 = vmatmul.mubr.bf16.vlgmr.msra.gmra.mrb[4].mxu0 %v864_v40 }
 0x23e   :  { %813 = vmatprep.mubr.msk.bf16.mxu0 %vm1018_vm0, %v1017_v0  ;;  %798 = vmatpush3.bf16.msra.mxu0 %v853_v45 }
 0x23f   :  { %799 = vmatprep.subr.bf16.mxu0 %v1017_v0 }
 0x242   :  { %800 = vmatpush3.bf16.msra.mxu0 %v854_v46 }
 0x243   :  { %801 = vmatprep.subr.bf16.mxu0 %v1017_v0 }
 0x246   :  { %802 = vmatpush3.bf16.msra.mxu0 %v855_v47 }
 0x247   :  { %803 = vmatprep.subr.bf16.mxu0 %v1017_v0 }
 0x24a   :  { %804 = vmatpush3.bf16.msra.mxu0 %v856_v48 }
 0x24b   :  { %805 = vmatprep.subr.bf16.mxu0 %v1017_v0 }
 0x24e   :  { %806 = vmatpush3.bf16.msra.mxu0 %v857_v57 }
 0x24f   :  { %807 = vmatprep.subr.bf16.mxu0 %v1017_v0 }
 0x252   :  { %808 = vmatpush3.bf16.msra.mxu0 %v858_v58 }
 0x253   :  { %809 = vmatprep.subr.bf16.mxu0 %v1017_v0 }
 0x256   :  { %810 = vmatpush3.bf16.msra.mxu0 %v859_v59 }
 0x257   :  { %811 = vmatprep.subr.bf16.mxu0 %v1017_v0 }
 0x25a   :  { %812 = vmatpush3.bf16.msra.mxu0 %v860_v60 }
 0x310   :  { %v408_v50 = vpop.f32.mrb[4].mxu0 }
 0x311   :  { %v409_v51 = vadd.f32 %v663_v49, %v408_v50  ;;  %v775_v52 = vpop.f32.mrb[5].mxu0 }
 0x312   :  { %v411_v53 = vpop.f32.mrb[6].mxu0 }
 0x313   :  { %v414_v54 = vpack.c.bf16 %v409_v51, %v409_v51  ;;  %v776_v55 = vpop.f32.mrb[7].mxu0 }
 0x315   :  { %865 = vtanh.bf16 %v414_v54 }
 0x320   :  { %v866_v56 = vpop.eup %865 }
 0x321   :  { %794 = vmatmul.mubr.bf16.vlgmr.msra.gmra.mrb[4].mxu1 %v866_v56 }
 0x3f4   :  { %v521_v62 = vpop.f32.mrb[4].mxu1 }
 0x3f5   :  { %v522_v63 = vadd.f32 %v672_v61, %v521_v62  ;;  %v795_v1 = vpop.f32.mrb[5].mxu1 }
 0x3f6   :  { %v524_v2 = vpop.f32.mrb[6].mxu1 }
 0x3f7   :  { %v527_v3 = vpack.c.bf16 %v522_v63, %v522_v63  ;;  %v796_v4 = vpop.f32.mrb[7].mxu1 }
 0x3f9   :  { %867 = vtanh.bf16 %v527_v3 }
 0x404   :  { %v868_v5 = vpop.eup %867 }
 0x405   :  { %814 = vmatmul.mubr.bf16.vlgmr.msra.gmra.mrb[8].mxu0 %v868_v5 }
 0x4d8   :  { %v634_v7 = vpop.f32.mrb[8].mxu0 }
 0x4d9   :  { %v635_v0 = vadd.f32 %v681_v6, %v634_v7  ;;  %v815_v8 = vpop.f32.mrb[9].mxu0 }
 0x4da   :  { %v637_v9 = vpop.f32.mrb[10].mxu0 }
 0x4db   :  { %641 = vst.msk [vmem:[%s1239_s11] sm:$0xff] %vm640_vm2, %v635_v0  ;;  %v816_v10 = vpop.f32.mrb[11].mxu0 }
 0x4dc   :  { %646 = vsyncpa [#allocation3], 1 }
 0x4dd   :  { %647 = vsyncpa [#allocation5], 1 }
 0x4de   :  { %648 = vsyncpa [#allocation8], 1 }
 0x4df   :  { %649 = vsyncpa [#allocation11], 1 }

</bundles_post_ra>
